<compile_context>
chip_gen: v7x
topology: tpu7x:2x2x1
jax: 0.10.0
libtpu: 0.0.40
codegen_flags: <defaults>
</compile_context>

<pallas_src>
import jax
import jax.numpy as jnp
from jax.experimental import pallas as pl
from jax.experimental.pallas import tpu as pltpu

LANE = 128
SUBLANE = 8
HIDDEN = 30


def _round_up(x, m):
    return ((x + m - 1) // m) * m


def _cdiv(a, b):
    return -(-a // b)


def _network_kernel(x_ref, w1_ref, b1_ref, w2_ref, b2_ref, out_ref):
    # State arrives as raw f32; cast to the matmul operand dtype in-kernel
    # (free VPU work -- avoids a wrapper-side cast/copy kernel).
    x = x_ref[...].astype(w1_ref.dtype)
    # fc1: (B, IN) @ (IN, Hp=128) -> f32 accumulate; bias + relu in f32.
    h = jnp.dot(x, w1_ref[...], preferred_element_type=jnp.float32)
    h = jnp.maximum(h + b1_ref[...], 0.0)
    # fc2: (B, Hp) @ (Hp, nb_action) -> f32 accumulate; bias in f32.
    q = jnp.dot(h.astype(w2_ref.dtype), w2_ref[...],
                preferred_element_type=jnp.float32)
    out_ref[...] = (q + b2_ref[...]).astype(out_ref.dtype)


def init_params(key, input_size, nb_action, hidden=HIDDEN):
    """nn.Linear-style U(-1/sqrt(fan_in), 1/sqrt(fan_in)) init, (in, out) layout."""
    k1, k2, k3, k4 = jax.random.split(key, 4)
    bound1 = 1.0 / jnp.sqrt(jnp.float32(input_size))
    bound2 = 1.0 / jnp.sqrt(jnp.float32(hidden))
    w1 = jax.random.uniform(k1, (input_size, hidden), jnp.float32, -bound1, bound1)
    b1 = jax.random.uniform(k2, (1, hidden), jnp.float32, -bound1, bound1)
    w2 = jax.random.uniform(k3, (hidden, nb_action), jnp.float32, -bound2, bound2)
    b2 = jax.random.uniform(k4, (1, nb_action), jnp.float32, -bound2, bound2)
    return w1, b1, w2, b2


def pad_params(w1, b1, w2, b2, compute_dtype=jnp.float32):
    """Zero-pad the hidden (lane) dim 30 -> 128 ONCE at init.

    compute_dtype controls the matmul operand dtype.  bfloat16 is valid on
    v5e/v6e/v7x alike (MXU is bf16-native on all three); biases stay float32
    and bias+relu+accumulation are done in f32 inside the kernel.
    Zero padding is exact: padded b1 lanes are 0 -> relu(0)=0, and the padded
    w2 rows are 0, so padded hidden columns contribute exactly nothing.
    """
    in_size, hidden = w1.shape
    nb_action = w2.shape[1]
    h_pad = _round_up(hidden, LANE)  # 30 -> 128; do NOT pad further (DMA-bound)
    w1_p = jnp.zeros((in_size, h_pad), compute_dtype).at[:, :hidden].set(
        w1.astype(compute_dtype))
    b1_p = jnp.zeros((1, h_pad), jnp.float32).at[:, :hidden].set(
        b1.reshape(1, hidden).astype(jnp.float32))
    w2_p = jnp.zeros((h_pad, nb_action), compute_dtype).at[:hidden, :].set(
        w2.astype(compute_dtype))
    b2_p = b2.reshape(1, nb_action).astype(jnp.float32)
    return w1_p, b1_p, w2_p, b2_p


def network_forward(state, padded_params, *, block_b=2048):
    """Forward pass. state: (B, input_size) f32; returns (B, nb_action) f32."""
    w1_p, b1_p, w2_p, b2_p = padded_params
    B, in_size = state.shape
    assert in_size == w1_p.shape[0]
    nb_action = w2_p.shape[1]

    if B <= block_b:
        # Single VMEM-resident block covering the whole batch.  Block dims equal
        # the full array dims, so any B (even 1 or 2) is legal with no padding.
        block_rows, n_blocks = B, 1
    else:
        # Tile the batch.  Round the block count up to an even number so v7x's
        # two TensorCores split the "parallel" axis evenly (neutral on v5e/v6e).
        n_blocks = _cdiv(B, block_b)
        if n_blocks % 2:
            n_blocks += 1
        block_rows = _round_up(_cdiv(B, n_blocks), SUBLANE)
        n_blocks = _cdiv(B, block_rows)
        # Partial last block: out-of-bounds input rows are garbage but each
        # output row depends only on its own input row, and out-of-bounds
        # output writes are masked by Pallas -> still exact.

    out = pl.pallas_call(
        _network_kernel,
        out_shape=jax.ShapeDtypeStruct((B, nb_action), jnp.float32),
        grid=(n_blocks,),
        in_specs=[
            pl.BlockSpec((block_rows, in_size), lambda i: (i, 0)),
            pl.BlockSpec(w1_p.shape, lambda i: (0, 0)),   # weights stay VMEM-resident
            pl.BlockSpec(b1_p.shape, lambda i: (0, 0)),
            pl.BlockSpec(w2_p.shape, lambda i: (0, 0)),
            pl.BlockSpec(b2_p.shape, lambda i: (0, 0)),
        ],
        out_specs=pl.BlockSpec((block_rows, nb_action), lambda i: (i, 0)),
        compiler_params=pltpu.CompilerParams(
            dimension_semantics=("parallel",)),
    )(state, w1_p, b1_p, w2_p, b2_p)
    return out


def reference_forward(state, w1, b1, w2, b2):
    h = jnp.maximum(state @ w1 + b1, 0.0)
    return h @ w2 + b2


if __name__ == "__main__":
    # Self-driving-car agent: input_size=5 (3 sensors + orientation, -orientation),
    # nb_action=3.  Tiny online batch of 2, plus replay-batch-sized runs.
    batch, input_size, nb_action = 2, 5, 3

    key = jax.random.PRNGKey(0)
    k_params, k_state, k_big = jax.random.split(key, 3)
    w1, b1, w2, b2 = init_params(k_params, input_size, nb_action)
    state = jax.random.normal(k_state, (batch, input_size), jnp.float32)

    # --- f32 path, tiny online batch (single block, no wrapper pad/cast) ---
    params_f32 = pad_params(w1, b1, w2, b2, jnp.float32)
    q = network_forward(state, params_f32)
    jax.block_until_ready(q)
    q_ref = reference_forward(state, w1, b1, w2, b2)
    assert q.shape == (batch, nb_action)
    assert jnp.allclose(q, q_ref, atol=1e-5, rtol=1e-5)

    # --- f32 path, replay-buffer batch (still a single block) ---
    big = jax.random.normal(k_big, (256, input_size), jnp.float32)
    q_big = network_forward(big, params_f32)
    jax.block_until_ready(q_big)
    assert jnp.allclose(q_big, reference_forward(big, w1, b1, w2, b2),
                        atol=1e-4, rtol=1e-4)

    # --- bf16 operand path (valid on v5e/v6e/v7x); state cast in-kernel ---
    params_bf16 = pad_params(w1, b1, w2, b2, jnp.bfloat16)
    q_bf16 = network_forward(big, params_bf16)
    jax.block_until_ready(q_bf16)
    assert jnp.allclose(q_bf16, reference_forward(big, w1, b1, w2, b2),
                        atol=5e-2, rtol=5e-2)

    # --- large batch -> gridded path (even block count, partial last block) ---
    huge = jax.random.normal(k_big, (4100, input_size), jnp.float32)
    q_huge = network_forward(huge, params_f32)
    jax.block_until_ready(q_huge)
    assert q_huge.shape == (4100, nb_action)
    assert jnp.allclose(q_huge, reference_forward(huge, w1, b1, w2, b2),
                        atol=1e-4, rtol=1e-4)

    print("KERNEL_OK")
</pallas_src>

<mosaic_0001>
module attributes {stable_mosaic.version = 11 : i64} {
  func.func @_network_kernel(%arg0: i32, %arg1: memref<2x5xf32, #tpu.memory_space<vmem>>, %arg2: memref<5x128xf32, #tpu.memory_space<vmem>>, %arg3: memref<1x128xf32, #tpu.memory_space<vmem>>, %arg4: memref<128x3xf32, #tpu.memory_space<vmem>>, %arg5: memref<1x3xf32, #tpu.memory_space<vmem>>, %arg6: memref<2x3xf32, #tpu.memory_space<vmem>>) attributes {dimension_semantics = [#tpu.dimension_semantics<parallel>], iteration_bounds = array<i64: 1>, scalar_prefetch = 0 : i64, scratch_operands = 0 : i64, tpu.core_type = #tpu.core_type<tc>, window_params = [{transform_indices = @transform_0, window_bounds = array<i64: 2, 5>}, {pipeline_mode = #tpu.pipeline_mode<synchronous>, transform_indices = @transform_1, window_bounds = array<i64: 5, 128>}, {pipeline_mode = #tpu.pipeline_mode<synchronous>, transform_indices = @transform_2, window_bounds = array<i64: 1, 128>}, {pipeline_mode = #tpu.pipeline_mode<synchronous>, transform_indices = @transform_3, window_bounds = array<i64: 128, 3>}, {pipeline_mode = #tpu.pipeline_mode<synchronous>, transform_indices = @transform_4, window_bounds = array<i64: 1, 3>}, {transform_indices = @transform_5, window_bounds = array<i64: 2, 3>}]} {
    %c0 = arith.constant 0 : index
    %c0_0 = arith.constant 0 : index
    %0 = vector.load %arg1[%c0, %c0_0] : memref<2x5xf32, #tpu.memory_space<vmem>>, vector<2x5xf32>
    %c0_1 = arith.constant 0 : index
    %c0_2 = arith.constant 0 : index
    %1 = vector.load %arg2[%c0_1, %c0_2] : memref<5x128xf32, #tpu.memory_space<vmem>>, vector<5x128xf32>
    %cst = arith.constant dense<0.000000e+00> : vector<2x128xf32>
    %2 = tpu.matmul %0, %1, %cst {dimension_numbers = #tpu.dot_dimension_numbers<[1], [0], [0], [1], [0, 0, 1, 1], [], []>} : vector<2x5xf32>, vector<5x128xf32>, vector<2x128xf32> -> vector<2x128xf32>
    %c0_3 = arith.constant 0 : index
    %c0_4 = arith.constant 0 : index
    %3 = vector.load %arg3[%c0_3, %c0_4] : memref<1x128xf32, #tpu.memory_space<vmem>>, vector<1x128xf32>
    %4 = vector.broadcast %3 : vector<1x128xf32> to vector<2x128xf32>
    %5 = arith.addf %2, %4 : vector<2x128xf32>
    %cst_5 = arith.constant 0.000000e+00 : f32
    %6 = vector.broadcast %cst_5 : f32 to vector<2x128xf32>
    %7 = arith.maximumf %5, %6 : vector<2x128xf32>
    %c0_6 = arith.constant 0 : index
    %c0_7 = arith.constant 0 : index
    %8 = vector.load %arg4[%c0_6, %c0_7] : memref<128x3xf32, #tpu.memory_space<vmem>>, vector<128x3xf32>
    %cst_8 = arith.constant dense<0.000000e+00> : vector<2x3xf32>
    %9 = tpu.matmul %7, %8, %cst_8 {dimension_numbers = #tpu.dot_dimension_numbers<[1], [0], [0], [1], [0, 0, 1, 1], [], []>} : vector<2x128xf32>, vector<128x3xf32>, vector<2x3xf32> -> vector<2x3xf32>
    %c0_9 = arith.constant 0 : index
    %c0_10 = arith.constant 0 : index
    %10 = vector.load %arg5[%c0_9, %c0_10] : memref<1x3xf32, #tpu.memory_space<vmem>>, vector<1x3xf32>
    %11 = vector.broadcast %10 : vector<1x3xf32> to vector<2x3xf32>
    %12 = arith.addf %9, %11 : vector<2x3xf32>
    %c0_11 = arith.constant 0 : index
    %c0_12 = arith.constant 0 : index
    %13 = vector.load %arg6[%c0_11, %c0_12] : memref<2x3xf32, #tpu.memory_space<vmem>>, vector<2x3xf32>
    tpu.vector_store %arg6[%c0_11, %c0_12], %12 {strides = array<i32>} : memref<2x3xf32, #tpu.memory_space<vmem>>, vector<2x3xf32>,
    return
  }
  func.func @transform_0(%arg0: i32) -> (i32, i32) {
    %c0_i32 = arith.constant 0 : i32
    %c0_i32_0 = arith.constant 0 : i32
    return %arg0, %c0_i32 : i32, i32
  }
  func.func @transform_1(%arg0: i32) -> (i32, i32) {
    %c0_i32 = arith.constant 0 : i32
    %c0_i32_0 = arith.constant 0 : i32
    %c0_i32_1 = arith.constant 0 : i32
    return %c0_i32, %c0_i32_0 : i32, i32
  }
  func.func @transform_2(%arg0: i32) -> (i32, i32) {
    %c0_i32 = arith.constant 0 : i32
    %c0_i32_0 = arith.constant 0 : i32
    %c0_i32_1 = arith.constant 0 : i32
    return %c0_i32, %c0_i32_0 : i32, i32
  }
  func.func @transform_3(%arg0: i32) -> (i32, i32) {
    %c0_i32 = arith.constant 0 : i32
    %c0_i32_0 = arith.constant 0 : i32
    %c0_i32_1 = arith.constant 0 : i32
    return %c0_i32, %c0_i32_0 : i32, i32
  }
  func.func @transform_4(%arg0: i32) -> (i32, i32) {
    %c0_i32 = arith.constant 0 : i32
    %c0_i32_0 = arith.constant 0 : i32
    %c0_i32_1 = arith.constant 0 : i32
    return %c0_i32, %c0_i32_0 : i32, i32
  }
  func.func @transform_5(%arg0: i32) -> (i32, i32) {
    %c0_i32 = arith.constant 0 : i32
    %c0_i32_0 = arith.constant 0 : i32
    return %arg0, %c0_i32 : i32, i32
  }
}

</mosaic_0001>

<bundles_post_ra>
// kernel: tpu_custom_call.1
= control target key start
LH: loop header
LB: loop body
LE: loop exit
PB: predicated region body
PF: predicated region fallthrough
CT: control target
= control target key end

     0   :  { %vm34_vm0 = vcmask 1044480   ;;  %vm30_vm1 = vcmask 39936   ;;  %v333_v1 = vmov 0.0   ;;  %vm334_vm2 = vmmov 0   ;;  %s439_s0 = inlined_call_operand.vmem [shape: f32[2,5], index: 0, kind: input, shape index: {}]   ;;  %s440_s1 = inlined_call_operand.vmem [shape: f32[5,128], index: 1, kind: input, shape index: {}]   ;;  %s441_s2 = inlined_call_operand.vmem [shape: f32[1,128], index: 2, kind: input, shape index: {}]   ;;  %s442_s3 = inlined_call_operand.vmem [shape: f32[128,3], index: 3, kind: input, shape index: {}]   ;;  %s443_s4 = inlined_call_operand.vmem [shape: f32[1,3], index: 4, kind: input, shape index: {}]   ;;  %s444_s5 = inlined_call_operand.hbm [shape: f32[2,3], index: 5, kind: output, shape index: {}]  }
   0x1   :  { %v22_v0 = vld [vmem:[%s440_s1] sm:$0x1f]  ;;  %241 = vmatprep.subr.mxu0 %v333_v1  ;;  %243 = vmatprep.mubr.msk.f32.mxu0 %vm334_vm2, %v333_v1  ;;  %v110_v4 = vld [vmem:[%s442_s3 + $0x8] sm:$0xff]  ;;  %v335_v5 = vmov 0.0|0.0   ;;  %v111_v7 = vld [vmem:[%s442_s3 + $0x10] sm:$0xff] }
   0x2   :  { %v21_v2 = vld [vmem:[%s439_s0] sm:$0x3]  ;;  %242 = vmatpush3.msk.msra.mxu0 %vm34_vm0, %v22_v0  ;;  %281 = vmatprep.subr.bf16.mxu1 %v335_v5  ;;  %v112_v8 = vld [vmem:[%s442_s3 + $0x18] sm:$0xff]  ;;  %v114_v11 = vld [vmem:[%s442_s3 + $0x28] sm:$0xff] }
   0x3   :  { %v109_v3 = vld [vmem:[%s442_s3] sm:$0xff]  ;;  %244 = vmatmul.mubr.msk.f32.vlgmr.msra.gmra.mrb[0].mxu0 %vm30_vm1, %v21_v2  ;;  %278 = vmatprep.mubr.msk.f32.mxu1 %vm334_vm2, %v333_v1  ;;  %v285_v9 = vpack.c.bf16 %v112_v8, %v111_v7 }
   0x4   :  { %v282_v6 = vpack.c.bf16 %v110_v4, %v109_v3  ;;  %v113_v10 = vld [vmem:[%s442_s3 + $0x20] sm:$0xff] }
   0x6   :  { %283 = vmatpush3.bf16.msra.mxu1 %v282_v6 }
   0x7   :  { %284 = vmatprep.subr.bf16.mxu1 %v335_v5 }
   0x8   :  { %10 = vsyncpa [#allocation3], 0  ;;  %v288_v12 = vpack.c.bf16 %v114_v11, %v113_v10  ;;  %v115_v13 = vld [vmem:[%s442_s3 + $0x30] sm:$0xff]  ;;  %v116_v14 = vld [vmem:[%s442_s3 + $0x38] sm:$0xff]  ;;  %s336_s29 = smov [#allocation2]   ;;  %vm202_vm3 = vcmask 17408  }
   0x9   :  { %v291_v15 = vpack.c.bf16 %v116_v14, %v115_v13  ;;  %v117_v16 = vld [vmem:[%s442_s3 + $0x40] sm:$0xff]  ;;  %v118_v17 = vld [vmem:[%s442_s3 + $0x48] sm:$0xff]  ;;  %v119_v19 = vld [vmem:[%s442_s3 + $0x50] sm:$0xff]  ;;  %s210_s30 = sshll.u32 %s336_s29, 4  ;;  %s211_s30 = int_to_ptr.vmem [resolvable:$true] %s210_s30 }
   0xa   :  { %286 = vmatpush3.bf16.msra.mxu1 %v285_v9  ;;  %v294_v18 = vpack.c.bf16 %v118_v17, %v117_v16  ;;  %v120_v20 = vld [vmem:[%s442_s3 + $0x58] sm:$0xff]  ;;  %v121_v22 = vld [vmem:[%s442_s3 + $0x60] sm:$0xff]  ;;  %v122_v23 = vld [vmem:[%s442_s3 + $0x68] sm:$0xff]  ;;  %p314_p1 = scmp.lt.s32.totalorder %s211_s30, %s211_s30 }
   0xb   :  { %287 = vmatprep.subr.bf16.mxu1 %v335_v5  ;;  %v297_v21 = vpack.c.bf16 %v120_v20, %v119_v19  ;;  %v300_v24 = vpack.c.bf16 %v122_v23, %v121_v22  ;;  %v123_v25 = vld [vmem:[%s442_s3 + $0x70] sm:$0xff]  ;;  %v124_v26 = vld [vmem:[%s442_s3 + $0x78] sm:$0xff]  ;;  %v218_v28 = vld [vmem:[%s441_s2] ss:$0 sm:$0xff]  ;;  %s309_s3 = scalar_lea.vmem %s211_s30, 32 }
   0xc   :  { %v303_v27 = vpack.c.bf16 %v124_v26, %v123_v25  ;;  %v221_v33 = vld [vmem:[%s443_s4] ss:$0 sm:$0xff]  ;;  %p310_p0 = scmp.ne.s32.totalorder %s211_s30, %s309_s3  ;;  %p315_p2 = scmp.lt.s32.totalorder %s309_s3, %s309_s3 }
   0xe   :  { %289 = vmatpush3.bf16.msra.mxu1 %v288_v12  ;;  %p316_p3 = por %p315_p2, %p314_p1 }
   0xf   :  { %290 = vmatprep.subr.bf16.mxu1 %v335_v5 }
  0x10   :  { %p317_p4 = pnand %p316_p3, %p310_p0 }
  0x12   :  { %292 = vmatpush3.bf16.msra.mxu1 %v291_v15 }
  0x13   :  { %293 = vmatprep.subr.bf16.mxu1 %v335_v5 }
  0x16   :  { %295 = vmatpush3.bf16.msra.mxu1 %v294_v18 }
  0x17   :  { %296 = vmatprep.subr.bf16.mxu1 %v335_v5 }
  0x1a   :  { %298 = vmatpush3.bf16.msra.mxu1 %v297_v21 }
  0x1b   :  { %299 = vmatprep.subr.bf16.mxu1 %v335_v5 }
  0x1e   :  { %301 = vmatpush3.bf16.msra.mxu1 %v300_v24 }
  0x1f   :  { %302 = vmatprep.subr.bf16.mxu1 %v335_v5 }
  0x22   :  { %304 = vmatpush3.bf16.msra.mxu1 %v303_v27 }
  0xd6   :  { %v104_v29 = vpop.f32.mrb[0].mxu0 }
  0xd7   :  { %v105_v30 = vadd.f32 %v218_v28, %v104_v29  ;;  %v245_v31 = vpop.f32.mrb[1].mxu0 }
  0xd9   :  { %v108_v32 = vmax.f32 %v105_v30, 0.0 }
  0xdb   :  { %279 = vmatmul.mubr.f32.vlgmr.msra.gmra.mrb[0].mxu1 %v108_v32 }
 0x1ae   :  { %v198_v34 = vpop.f32.mrb[0].mxu1 }
 0x1af   :  { %v199_v35 = vadd.f32 %v221_v33, %v198_v34  ;;  %v280_v36 = vpop.f32.mrb[1].mxu1 }
 0x1b1   :  { %203 = vst.msk [vmem:[#allocation2] sm:$0x3] %vm202_vm3, %v199_v35 }
 0x1b2   :  { %320 = shalt.err (!%p317_p4)
}
 0x1b3   :  { %s321_s7 = scalar_lea.hbm %s444_s5, 32 }
 0x1b4   :  { %p322_p5 = scmp.ne.s32.totalorder %s444_s5, %s321_s7  ;;  %p325_p6 = scmp.lt.u32.totalorder %s321_s7, %s444_s5 }
 0x1b6   :  { %p327_p7 = pnand %p325_p6, %p322_p5 }
 0x1b8   :  { %330 = shalt.err (!%p327_p7)
}
 0x1b9   :  { %213 = dma.vmem_to_hbm [thread:$0]  %s211_s30, 32, %s444_s5, [#allocation3]  }
 0x1ba   :  { %331 = dma.done.wait [#allocation3], 32  }
 0x1bb   :  { %332 = vsyncadd [#allocation3], 4294967264 }
 0x1bc   :  { %217 = vsyncpa [#allocation3], 1 }

</bundles_post_ra>
